<compile_context>
chip_gen: v7x
topology: tpu7x:2x2x1
jax: 0.10.0
libtpu: 0.0.40
codegen_flags: <defaults>
</compile_context>

<pallas_src>
import functools
import math

import jax
import jax.numpy as jnp
from jax.experimental import pallas as pl
from jax.experimental.pallas import tpu as pltpu


def mlp_attention_kernel(x_ref, w01_ref, b01_ref, w20t_ref, gamma_ref, beta_ref,
                         g_ref, gt_ref, out_ref, *, width, n_groups,
                         mm_dtype=jnp.float32):
    """One batch-aligned column tile of MLP_Attention in the (C, cols) layout.

    Columns [g*width, (g+1)*width) of the tile belong to batch-group g
    (g in [0, n_groups)).  Per-group sums go through the MXU via the one-hot
    indicator matrices g_ref (cols, n_groups) / gt_ref (n_groups, cols).
    """
    c_dim, cols = x_ref.shape
    x = x_ref[...]                                                    # (C, cols)

    # conv1 + linear_0 folded:  attn = (W0 W1) x + (W0 b1)
    attn = jnp.dot(w01_ref[...].astype(mm_dtype), x.astype(mm_dtype),
                   preferred_element_type=jnp.float32) + b01_ref[...]  # (mid, cols)

    # --- softmax over the spatial axis, independently per batch group --------
    # One (1, cols) iota; per-group masks broadcast against the full tile.
    col = jax.lax.broadcasted_iota(jnp.int32, (1, cols), 1)
    m_full = jnp.zeros_like(attn)
    for g in range(n_groups):                      # n_groups is static & small
        sel = (col >= g * width) & (col < (g + 1) * width)            # (1, cols)
        m_g = jnp.max(jnp.where(sel, attn, -jnp.inf), axis=-1, keepdims=True)
        m_full = jnp.where(sel, m_g, m_full)
    p = jnp.exp(attn - m_full)

    gmat = g_ref[...]                               # (cols, n_groups) one-hot
    gmat_t = gt_ref[...]                            # (n_groups, cols)

    # Per-group denominators via two tiny MXU matmuls; EXACT normalization.
    denom_g = jnp.dot(p, gmat, preferred_element_type=jnp.float32)      # (mid, G)
    denom = jnp.dot(denom_g, gmat_t, preferred_element_type=jnp.float32)  # (mid, cols)
    p = p / denom

    # linear_1 + conv2[0] folded:  z = (W2 W0^T) p
    z = jnp.dot(w20t_ref[...].astype(mm_dtype), p.astype(mm_dtype),
                preferred_element_type=jnp.float32)                   # (C, cols)

    # --- LayerNorm over [channel, dim] per batch group (two-pass variance) ---
    n_elem = jnp.float32(c_dim * width)
    sum_cg = jnp.dot(z, gmat, preferred_element_type=jnp.float32)     # (C, G)
    mu_g = jnp.sum(sum_cg, axis=0, keepdims=True) / n_elem            # (1, G)
    mu = jnp.dot(mu_g, gmat_t, preferred_element_type=jnp.float32)    # (1, cols)
    zc = z - mu
    ssq_cg = jnp.dot(zc * zc, gmat, preferred_element_type=jnp.float32)
    var_g = jnp.sum(ssq_cg, axis=0, keepdims=True) / n_elem           # (1, G)
    inv_std_g = 1.0 / jnp.sqrt(var_g + 1e-5)
    inv_std = jnp.dot(inv_std_g, gmat_t, preferred_element_type=jnp.float32)

    gamma = gamma_ref[...]                          # (C, W)
    beta = beta_ref[...]
    if n_groups > 1:                                # broadcast once, in VMEM
        gamma = jnp.concatenate([gamma] * n_groups, axis=-1)
        beta = jnp.concatenate([beta] * n_groups, axis=-1)

    zn = zc * inv_std * gamma + beta

    # residual + ReLU
    out_ref[...] = jnp.maximum(zn + x, 0.0).astype(out_ref.dtype)


def _choose_batches_per_tile(B, W):
    """Smallest divisor of B whose tile width bpt*W is a multiple of 128;
    falls back to the whole batch in one tile (full-extent block) otherwise."""
    for bpt in range(1, B + 1):
        if B % bpt == 0 and (bpt * W) % 128 == 0:
            return bpt
    return B


def mlp_attention(x, w1, b1, w0, w2, gamma, beta, *, matmul_dtype=jnp.float32):
    """x: (B, C, W) float32; weights in PyTorch Conv1d layout (k=1 squeezed).

    matmul_dtype: operand dtype for the two wide MXU matmuls (accumulation is
    always f32).  Use jnp.bfloat16 on v6e/v7x at production sizes.
    """
    B, C, W = x.shape
    mid = w0.shape[0]

    # ---- algebraic folds (wrapper-side, done once per weight set) ----------
    hp = jax.lax.Precision.HIGHEST
    w01 = jnp.dot(w0, w1, precision=hp)                      # (mid, C)
    b01 = jnp.dot(w0, b1, precision=hp).reshape(mid, 1)      # (mid, 1)
    w20t = jnp.dot(w2, w0.T, precision=hp)                   # (C, mid)

    # ---- batch-aligned column tiling ----------------------------------------
    bpt = _choose_batches_per_tile(B, W)       # batch groups per column tile
    tile_cols = bpt * W
    num_tiles = B // bpt

    # One-hot group-indicator matrices (same for every tile, stay resident).
    gid = jnp.arange(tile_cols, dtype=jnp.int32) // W
    gmat = (gid[:, None] == jnp.arange(bpt, dtype=jnp.int32)[None, :]).astype(jnp.float32)
    gmat_t = gmat.T

    # Layout plumbing: (B, C, W) -> (C, B*W) so every 1x1 conv is one matmul.
    x2 = jnp.transpose(x, (1, 0, 2)).reshape(C, B * W)

    kernel = functools.partial(mlp_attention_kernel, width=W, n_groups=bpt,
                               mm_dtype=matmul_dtype)

    out2 = pl.pallas_call(
        kernel,
        out_shape=jax.ShapeDtypeStruct((C, B * W), jnp.float32),
        grid_spec=pltpu.PrefetchScalarGridSpec(
            num_scalar_prefetch=0,
            grid=(num_tiles,),
            in_specs=[
                pl.BlockSpec((C, tile_cols), lambda i: (0, i)),   # x tile
                pl.BlockSpec((mid, C), lambda i: (0, 0)),         # W0 @ W1
                pl.BlockSpec((mid, 1), lambda i: (0, 0)),         # W0 @ b1
                pl.BlockSpec((C, mid), lambda i: (0, 0)),         # W2 @ W0^T
                pl.BlockSpec((C, W), lambda i: (0, 0)),           # LN gamma
                pl.BlockSpec((C, W), lambda i: (0, 0)),           # LN beta
                pl.BlockSpec((tile_cols, bpt), lambda i: (0, 0)),  # group one-hot
                pl.BlockSpec((bpt, tile_cols), lambda i: (0, 0)),  # its transpose
            ],
            out_specs=pl.BlockSpec((C, tile_cols), lambda i: (0, i)),
        ),
        compiler_params=pltpu.CompilerParams(
            dimension_semantics=("parallel",)),
    )(x2, w01, b01, w20t, gamma, beta, gmat, gmat_t)

    # Back to the PyTorch (B, C, W) layout.
    return jnp.transpose(out2.reshape(C, B, W), (1, 0, 2))


def mlp_attention_ref(x, w1, b1, w0, w2, gamma, beta):
    """Plain-JAX reference mirroring the PyTorch forward."""
    hp = jax.lax.Precision.HIGHEST
    idn = x
    h = jnp.einsum('oc,bcw->bow', w1, x, precision=hp) + b1[None, :, None]
    attn = jnp.einsum('mc,bcw->bmw', w0, h, precision=hp)
    attn = jax.nn.softmax(attn, axis=-1)
    y = jnp.einsum('mc,bmw->bcw', w0, attn, precision=hp)
    z = jnp.einsum('oc,bcw->bow', w2, y, precision=hp)
    mu = jnp.mean(z, axis=(1, 2), keepdims=True)
    var = jnp.mean((z - mu) ** 2, axis=(1, 2), keepdims=True)
    zn = (z - mu) / jnp.sqrt(var + 1e-5)
    zn = zn * gamma[None] + beta[None]
    return jnp.maximum(zn + idn, 0.0)


if __name__ == "__main__":
    B, C, W, MID = 2, 4, 16, 64   # batch, channel, dim (spatial), mid_dim

    key = jax.random.PRNGKey(0)
    k_x, k_w1, k_b1, k_w0, k_w2 = jax.random.split(key, 5)

    x = jax.random.normal(k_x, (B, C, W), dtype=jnp.float32)

    # Deterministic init mimicking the module's __init__ (Conv1d: std = sqrt(2/(k*out_ch)))
    w1 = jax.random.normal(k_w1, (C, C), dtype=jnp.float32) * math.sqrt(2.0 / C)
    b1 = jax.random.normal(k_b1, (C,), dtype=jnp.float32) * 0.1
    w0 = jax.random.normal(k_w0, (MID, C), dtype=jnp.float32) * math.sqrt(2.0 / MID)
    w2 = jax.random.normal(k_w2, (C, C), dtype=jnp.float32) * math.sqrt(2.0 / C)
    gamma = jnp.ones((C, W), dtype=jnp.float32)   # LayerNorm weight
    beta = jnp.zeros((C, W), dtype=jnp.float32)   # LayerNorm bias

    out = mlp_attention(x, w1, b1, w0, w2, gamma, beta)
    out = jax.block_until_ready(out)

    ref = mlp_attention_ref(x, w1, b1, w0, w2, gamma, beta)
    assert out.shape == (B, C, W)
    # Exact softmax normalization + two-pass LayerNorm stats -> tolerance only
    # covers MXU-vs-XLA f32 matmul rounding from the folded weight products.
    assert jnp.allclose(out, ref, atol=2e-3, rtol=2e-3), "mismatch vs reference"

    print("KERNEL_OK")
</pallas_src>

<mosaic_0001>
module attributes {stable_mosaic.version = 11 : i64} {
  func.func @mlp_attention_kernel(%arg0: i32, %arg1: memref<4x32xf32, #tpu.memory_space<vmem>>, %arg2: memref<64x4xf32, #tpu.memory_space<vmem>>, %arg3: memref<64x1xf32, #tpu.memory_space<vmem>>, %arg4: memref<4x64xf32, #tpu.memory_space<vmem>>, %arg5: memref<4x16xf32, #tpu.memory_space<vmem>>, %arg6: memref<4x16xf32, #tpu.memory_space<vmem>>, %arg7: memref<32x2xf32, #tpu.memory_space<vmem>>, %arg8: memref<2x32xf32, #tpu.memory_space<vmem>>, %arg9: memref<4x32xf32, #tpu.memory_space<vmem>>) attributes {dimension_semantics = [#tpu.dimension_semantics<parallel>], iteration_bounds = array<i64: 1>, scalar_prefetch = 0 : i64, scratch_operands = 0 : i64, tpu.core_type = #tpu.core_type<tc>, window_params = [{transform_indices = @transform_0, window_bounds = array<i64: 4, 32>}, {pipeline_mode = #tpu.pipeline_mode<synchronous>, transform_indices = @transform_1, window_bounds = array<i64: 64, 4>}, {pipeline_mode = #tpu.pipeline_mode<synchronous>, transform_indices = @transform_2, window_bounds = array<i64: 64, 1>}, {pipeline_mode = #tpu.pipeline_mode<synchronous>, transform_indices = @transform_3, window_bounds = array<i64: 4, 64>}, {pipeline_mode = #tpu.pipeline_mode<synchronous>, transform_indices = @transform_4, window_bounds = array<i64: 4, 16>}, {pipeline_mode = #tpu.pipeline_mode<synchronous>, transform_indices = @transform_5, window_bounds = array<i64: 4, 16>}, {pipeline_mode = #tpu.pipeline_mode<synchronous>, transform_indices = @transform_6, window_bounds = array<i64: 32, 2>}, {pipeline_mode = #tpu.pipeline_mode<synchronous>, transform_indices = @transform_7, window_bounds = array<i64: 2, 32>}, {transform_indices = @transform_8, window_bounds = array<i64: 4, 32>}]} {
    %c0 = arith.constant 0 : index
    %c0_0 = arith.constant 0 : index
    %0 = vector.load %arg1[%c0, %c0_0] : memref<4x32xf32, #tpu.memory_space<vmem>>, vector<4x32xf32>
    %c0_1 = arith.constant 0 : index
    %c0_2 = arith.constant 0 : index
    %1 = vector.load %arg2[%c0_1, %c0_2] : memref<64x4xf32, #tpu.memory_space<vmem>>, vector<64x4xf32>
    %cst = arith.constant dense<0.000000e+00> : vector<64x32xf32>
    %2 = tpu.matmul %1, %0, %cst {dimension_numbers = #tpu.dot_dimension_numbers<[1], [0], [0], [1], [0, 0, 1, 1], [], []>} : vector<64x4xf32>, vector<4x32xf32>, vector<64x32xf32> -> vector<64x32xf32>
    %c0_3 = arith.constant 0 : index
    %c0_4 = arith.constant 0 : index
    %3 = vector.load %arg3[%c0_3, %c0_4] : memref<64x1xf32, #tpu.memory_space<vmem>>, vector<64x1xf32>
    %4 = vector.broadcast %3 : vector<64x1xf32> to vector<64x32xf32>
    %5 = arith.addf %2, %4 : vector<64x32xf32>
    %6 = tpu.iota {dimensions = array<i32: 1>} : vector<1x32xi32>
    %cst_5 = arith.constant 0.000000e+00 : f32
    %7 = vector.broadcast %cst_5 : f32 to vector<64x32xf32>
    %c0_i32 = arith.constant 0 : i32
    %8 = vector.broadcast %c0_i32 : i32 to vector<1x32xi32>
    %9 = arith.cmpi sge, %6, %8 : vector<1x32xi32>
    %c16_i32 = arith.constant 16 : i32
    %10 = vector.broadcast %c16_i32 : i32 to vector<1x32xi32>
    %11 = arith.cmpi slt, %6, %10 : vector<1x32xi32>
    %12 = arith.andi %9, %11 : vector<1x32xi1>
    %cst_6 = arith.constant 0xFF800000 : f32
    %13 = vector.shape_cast %12 : vector<1x32xi1> to vector<1x32xi1>
    %14 = vector.broadcast %13 : vector<1x32xi1> to vector<64x32xi1>
    %15 = vector.broadcast %cst_6 : f32 to vector<64x32xf32>
    %16 = arith.select %14, %5, %15 : vector<64x32xi1>, vector<64x32xf32>
    %cst_7 = arith.constant dense<0xFF800000> : vector<64xf32>
    %17 = vector.multi_reduction <maximumf>, %16, %cst_7 [1] : vector<64x32xf32> to vector<64xf32>
    %18 = vector.shape_cast %17 : vector<64xf32> to vector<64x1xf32>
    %19 = vector.shape_cast %12 : vector<1x32xi1> to vector<1x32xi1>
    %20 = vector.broadcast %19 : vector<1x32xi1> to vector<64x32xi1>
    %21 = vector.shape_cast %18 : vector<64x1xf32> to vector<64x1xf32>
    %22 = vector.broadcast %21 : vector<64x1xf32> to vector<64x32xf32>
    %23 = arith.select %20, %22, %7 : vector<64x32xi1>, vector<64x32xf32>
    %c16_i32_8 = arith.constant 16 : i32
    %24 = vector.broadcast %c16_i32_8 : i32 to vector<1x32xi32>
    %25 = arith.cmpi sge, %6, %24 : vector<1x32xi32>
    %c32_i32 = arith.constant 32 : i32
    %26 = vector.broadcast %c32_i32 : i32 to vector<1x32xi32>
    %27 = arith.cmpi slt, %6, %26 : vector<1x32xi32>
    %28 = arith.andi %25, %27 : vector<1x32xi1>
    %cst_9 = arith.constant 0xFF800000 : f32
    %29 = vector.shape_cast %28 : vector<1x32xi1> to vector<1x32xi1>
    %30 = vector.broadcast %29 : vector<1x32xi1> to vector<64x32xi1>
    %31 = vector.broadcast %cst_9 : f32 to vector<64x32xf32>
    %32 = arith.select %30, %5, %31 : vector<64x32xi1>, vector<64x32xf32>
    %cst_10 = arith.constant dense<0xFF800000> : vector<64xf32>
    %33 = vector.multi_reduction <maximumf>, %32, %cst_10 [1] : vector<64x32xf32> to vector<64xf32>
    %34 = vector.shape_cast %33 : vector<64xf32> to vector<64x1xf32>
    %35 = vector.shape_cast %28 : vector<1x32xi1> to vector<1x32xi1>
    %36 = vector.broadcast %35 : vector<1x32xi1> to vector<64x32xi1>
    %37 = vector.shape_cast %34 : vector<64x1xf32> to vector<64x1xf32>
    %38 = vector.broadcast %37 : vector<64x1xf32> to vector<64x32xf32>
    %39 = arith.select %36, %38, %23 : vector<64x32xi1>, vector<64x32xf32>
    %40 = arith.subf %5, %39 : vector<64x32xf32>
    %41 = math.exp %40 : vector<64x32xf32>
    %c0_11 = arith.constant 0 : index
    %c0_12 = arith.constant 0 : index
    %42 = vector.load %arg7[%c0_11, %c0_12] : memref<32x2xf32, #tpu.memory_space<vmem>>, vector<32x2xf32>
    %c0_13 = arith.constant 0 : index
    %c0_14 = arith.constant 0 : index
    %43 = vector.load %arg8[%c0_13, %c0_14] : memref<2x32xf32, #tpu.memory_space<vmem>>, vector<2x32xf32>
    %cst_15 = arith.constant dense<0.000000e+00> : vector<64x2xf32>
    %44 = tpu.matmul %41, %42, %cst_15 {dimension_numbers = #tpu.dot_dimension_numbers<[1], [0], [0], [1], [0, 0, 1, 1], [], []>} : vector<64x32xf32>, vector<32x2xf32>, vector<64x2xf32> -> vector<64x2xf32>
    %cst_16 = arith.constant dense<0.000000e+00> : vector<64x32xf32>
    %45 = tpu.matmul %44, %43, %cst_16 {dimension_numbers = #tpu.dot_dimension_numbers<[1], [0], [0], [1], [0, 0, 1, 1], [], []>} : vector<64x2xf32>, vector<2x32xf32>, vector<64x32xf32> -> vector<64x32xf32>
    %46 = arith.divf %41, %45 : vector<64x32xf32>
    %c0_17 = arith.constant 0 : index
    %c0_18 = arith.constant 0 : index
    %47 = vector.load %arg4[%c0_17, %c0_18] : memref<4x64xf32, #tpu.memory_space<vmem>>, vector<4x64xf32>
    %cst_19 = arith.constant dense<0.000000e+00> : vector<4x32xf32>
    %48 = tpu.matmul %47, %46, %cst_19 {dimension_numbers = #tpu.dot_dimension_numbers<[1], [0], [0], [1], [0, 0, 1, 1], [], []>} : vector<4x64xf32>, vector<64x32xf32>, vector<4x32xf32> -> vector<4x32xf32>
    %cst_20 = arith.constant dense<0.000000e+00> : vector<4x2xf32>
    %49 = tpu.matmul %48, %42, %cst_20 {dimension_numbers = #tpu.dot_dimension_numbers<[1], [0], [0], [1], [0, 0, 1, 1], [], []>} : vector<4x32xf32>, vector<32x2xf32>, vector<4x2xf32> -> vector<4x2xf32>
    %cst_21 = arith.constant dense<0.000000e+00> : vector<2xf32>
    %50 = vector.multi_reduction <add>, %49, %cst_21 [0] : vector<4x2xf32> to vector<2xf32>
    %51 = vector.shape_cast %50 : vector<2xf32> to vector<1x2xf32>
    %cst_22 = arith.constant 6.400000e+01 : f32
    %52 = vector.broadcast %cst_22 : f32 to vector<1x2xf32>
    %53 = arith.divf %51, %52 : vector<1x2xf32>
    %cst_23 = arith.constant dense<0.000000e+00> : vector<1x32xf32>
    %54 = tpu.matmul %53, %43, %cst_23 {dimension_numbers = #tpu.dot_dimension_numbers<[1], [0], [0], [1], [0, 0, 1, 1], [], []>} : vector<1x2xf32>, vector<2x32xf32>, vector<1x32xf32> -> vector<1x32xf32>
    %55 = vector.broadcast %54 : vector<1x32xf32> to vector<4x32xf32>
    %56 = arith.subf %48, %55 : vector<4x32xf32>
    %57 = arith.mulf %56, %56 : vector<4x32xf32>
    %cst_24 = arith.constant dense<0.000000e+00> : vector<4x2xf32>
    %58 = tpu.matmul %57, %42, %cst_24 {dimension_numbers = #tpu.dot_dimension_numbers<[1], [0], [0], [1], [0, 0, 1, 1], [], []>} : vector<4x32xf32>, vector<32x2xf32>, vector<4x2xf32> -> vector<4x2xf32>
    %cst_25 = arith.constant dense<0.000000e+00> : vector<2xf32>
    %59 = vector.multi_reduction <add>, %58, %cst_25 [0] : vector<4x2xf32> to vector<2xf32>
    %60 = vector.shape_cast %59 : vector<2xf32> to vector<1x2xf32>
    %cst_26 = arith.constant 6.400000e+01 : f32
    %61 = vector.broadcast %cst_26 : f32 to vector<1x2xf32>
    %62 = arith.divf %60, %61 : vector<1x2xf32>
    %cst_27 = arith.constant 9.99999974E-6 : f32
    %63 = vector.broadcast %cst_27 : f32 to vector<1x2xf32>
    %64 = arith.addf %62, %63 : vector<1x2xf32>
    %65 = math.sqrt %64 : vector<1x2xf32>
    %cst_28 = arith.constant 1.000000e+00 : f32
    %66 = vector.broadcast %cst_28 : f32 to vector<1x2xf32>
    %67 = arith.divf %66, %65 : vector<1x2xf32>
    %cst_29 = arith.constant dense<0.000000e+00> : vector<1x32xf32>
    %68 = tpu.matmul %67, %43, %cst_29 {dimension_numbers = #tpu.dot_dimension_numbers<[1], [0], [0], [1], [0, 0, 1, 1], [], []>} : vector<1x2xf32>, vector<2x32xf32>, vector<1x32xf32> -> vector<1x32xf32>
    %c0_30 = arith.constant 0 : index
    %c0_31 = arith.constant 0 : index
    %69 = vector.load %arg5[%c0_30, %c0_31] : memref<4x16xf32, #tpu.memory_space<vmem>>, vector<4x16xf32>
    %c0_32 = arith.constant 0 : index
    %c0_33 = arith.constant 0 : index
    %70 = vector.load %arg6[%c0_32, %c0_33] : memref<4x16xf32, #tpu.memory_space<vmem>>, vector<4x16xf32>
    %71 = tpu.concatenate %69, %69 in 1 : vector<4x16xf32>, vector<4x16xf32> -> vector<4x32xf32>
    %72 = tpu.concatenate %70, %70 in 1 : vector<4x16xf32>, vector<4x16xf32> -> vector<4x32xf32>
    %73 = vector.broadcast %68 : vector<1x32xf32> to vector<4x32xf32>
    %74 = arith.mulf %56, %73 : vector<4x32xf32>
    %75 = arith.mulf %74, %71 : vector<4x32xf32>
    %76 = arith.addf %75, %72 : vector<4x32xf32>
    %77 = arith.addf %76, %0 : vector<4x32xf32>
    %cst_34 = arith.constant 0.000000e+00 : f32
    %78 = vector.broadcast %cst_34 : f32 to vector<4x32xf32>
    %79 = arith.maximumf %77, %78 : vector<4x32xf32>
    %c0_35 = arith.constant 0 : index
    %c0_36 = arith.constant 0 : index
    %80 = vector.load %arg9[%c0_35, %c0_36] : memref<4x32xf32, #tpu.memory_space<vmem>>, vector<4x32xf32>
    tpu.vector_store %arg9[%c0_35, %c0_36], %79 {strides = array<i32>} : memref<4x32xf32, #tpu.memory_space<vmem>>, vector<4x32xf32>,
    return
  }
  func.func @transform_0(%arg0: i32) -> (i32, i32) {
    %c0_i32 = arith.constant 0 : i32
    %c0_i32_0 = arith.constant 0 : i32
    return %c0_i32, %arg0 : i32, i32
  }
  func.func @transform_1(%arg0: i32) -> (i32, i32) {
    %c0_i32 = arith.constant 0 : i32
    %c0_i32_0 = arith.constant 0 : i32
    %c0_i32_1 = arith.constant 0 : i32
    return %c0_i32, %c0_i32_0 : i32, i32
  }
  func.func @transform_2(%arg0: i32) -> (i32, i32) {
    %c0_i32 = arith.constant 0 : i32
    %c0_i32_0 = arith.constant 0 : i32
    %c0_i32_1 = arith.constant 0 : i32
    return %c0_i32, %c0_i32_0 : i32, i32
  }
  func.func @transform_3(%arg0: i32) -> (i32, i32) {
    %c0_i32 = arith.constant 0 : i32
    %c0_i32_0 = arith.constant 0 : i32
    %c0_i32_1 = arith.constant 0 : i32
    return %c0_i32, %c0_i32_0 : i32, i32
  }
  func.func @transform_4(%arg0: i32) -> (i32, i32) {
    %c0_i32 = arith.constant 0 : i32
    %c0_i32_0 = arith.constant 0 : i32
    %c0_i32_1 = arith.constant 0 : i32
    return %c0_i32, %c0_i32_0 : i32, i32
  }
  func.func @transform_5(%arg0: i32) -> (i32, i32) {
    %c0_i32 = arith.constant 0 : i32
    %c0_i32_0 = arith.constant 0 : i32
    %c0_i32_1 = arith.constant 0 : i32
    return %c0_i32, %c0_i32_0 : i32, i32
  }
  func.func @transform_6(%arg0: i32) -> (i32, i32) {
    %c0_i32 = arith.constant 0 : i32
    %c0_i32_0 = arith.constant 0 : i32
    %c0_i32_1 = arith.constant 0 : i32
    return %c0_i32, %c0_i32_0 : i32, i32
  }
  func.func @transform_7(%arg0: i32) -> (i32, i32) {
    %c0_i32 = arith.constant 0 : i32
    %c0_i32_0 = arith.constant 0 : i32
    %c0_i32_1 = arith.constant 0 : i32
    return %c0_i32, %c0_i32_0 : i32, i32
  }
  func.func @transform_8(%arg0: i32) -> (i32, i32) {
    %c0_i32 = arith.constant 0 : i32
    %c0_i32_0 = arith.constant 0 : i32
    return %c0_i32, %arg0 : i32, i32
  }
}

</mosaic_0001>

<bundles_post_ra>
// kernel: tpu_custom_call.1
= control target key start
LH: loop header
LB: loop body
LE: loop exit
PB: predicated region body
PF: predicated region fallthrough
CT: control target
= control target key end

     0   :  { %vm112_vm0 = vcmask 1043456   ;;  %vm87_vm1 = vcmask 31744   ;;  %v1346_v4 = vmov 0   ;;  %s1724_s0 = inlined_call_operand.vmem [shape: f32[4,32], index: 0, kind: input, shape index: {}]   ;;  %s1725_s1 = inlined_call_operand.vmem [shape: f32[64,4], index: 1, kind: input, shape index: {}]   ;;  %s1726_s2 = inlined_call_operand.vmem [shape: f32[64,1], index: 2, kind: input, shape index: {}]   ;;  %s1727_s3 = inlined_call_operand.vmem [shape: f32[4,64], index: 3, kind: input, shape index: {}]   ;;  %s1728_s4 = inlined_call_operand.vmem [shape: f32[4,16], index: 4, kind: input, shape index: {}]   ;;  %s1729_s5 = inlined_call_operand.vmem [shape: f32[4,16], index: 5, kind: input, shape index: {}]   ;;  %s1730_s6 = inlined_call_operand.vmem [shape: f32[32,2], index: 6, kind: input, shape index: {}]   ;;  %s1731_s7 = inlined_call_operand.vmem [shape: f32[2,32], index: 7, kind: input, shape index: {}]   ;;  %s1732_s8 = inlined_call_operand.hbm [shape: f32[4,32], index: 8, kind: output, shape index: {}]  }
   0x1   :  { %v1400_v0 = vld [vmem:[%s1724_s0] sm:$0xf]  ;;  %v32_v2 = vld [vmem:[%s1725_s1 + $0x8] sm:$0xff]  ;;  %v33_v3 = vld [vmem:[%s1725_s1 + $0x10] sm:$0xff]  ;;  %1284 = vset.pattern.permute.xlu0 %v1346_v4  ;;  %1285 = vset.pattern.permute.xlu1 %v1346_v4 }
   0x2   :  { %v31_v1 = vld [vmem:[%s1725_s1] sm:$0xff]  ;;  %1147 = vmatprep.subr.msk.mxu0 %vm112_vm0, %v1400_v0  ;;  %v34_v6 = vld [vmem:[%s1725_s1 + $0x18] sm:$0xff]  ;;  %v41_v7 = vld [vmem:[%s1726_s2 + $0x10] sm:$0xff] }
   0x3   :  { %1149 = vmatprep.mubr.msk.f32.mxu0 %vm87_vm1, %v31_v1  ;;  %1148 = vmatpush3.msk.msra.mxu0 %vm112_vm0, %v1400_v0  ;;  %v39_v5 = vld [vmem:[%s1726_s2] sm:$0xff]  ;;  %v40_v9 = vld [vmem:[%s1726_s2 + $0x8] sm:$0xff] }
   0x4   :  { %1150 = vmatmul.mubr.msk.f32.vlgmr.msra.gmra.mrb[0].mxu0 %vm87_vm1, %v32_v2  ;;  %49 = vperm.xlu0 %1284, %v39_v5   ;;  %v35_v8 = vld [vmem:[%s1725_s1 + $0x20] sm:$0xff] }
   0x5   :  { %1152 = vmatprep.mubr.msk.f32.mxu0 %vm87_vm1, %v33_v3  ;;  %59 = vperm.xlu1 %1285, %v41_v7  }
   0x6   :  { %13 = vsyncpa [#allocation3], 0  ;;  %v42_v10 = vld [vmem:[%s1726_s2 + $0x18] sm:$0xff]  ;;  %v36_v11 = vld [vmem:[%s1725_s1 + $0x28] sm:$0xff]  ;;  %v221_v18 = vlaneseq  ;;  %vm236_vm6 = vcmask 261120   ;;  %vm497_vm7 = vcmask 1041408  }
   0x7   :  { %v37_v12 = vld [vmem:[%s1725_s1 + $0x30] sm:$0xff]  ;;  %v43_v13 = vld [vmem:[%s1726_s2 + $0x20] sm:$0xff]  ;;  %v44_v14 = vld [vmem:[%s1726_s2 + $0x28] sm:$0xff]  ;;  %vm472_vm8 = vcmask 15360   ;;  %vm1348_vm9 = vmmov 0   ;;  %vm623_vm10 = vcmask 523264  }
   0x8   :  { %1153 = vmatmul.mubr.msk.f32.gmra.mrb[2].mxu0 %vm87_vm1, %v34_v6  ;;  %54 = vperm.xlu0 %1284, %v40_v9   ;;  %v38_v15 = vld [vmem:[%s1725_s1 + $0x38] sm:$0xff]  ;;  %v45_v16 = vld [vmem:[%s1726_s2 + $0x30] sm:$0xff]  ;;  %v1461_v19 = vand.u32 127, %v221_v18  ;;  %vm770_vm11 = vcmask 11264   ;;  %s1350_s26 = smov 16   ;;  %vm1029_vm14 = vcmask 130048  }
   0x9   :  { %1155 = vmatprep.mubr.msk.f32.mxu0 %vm87_vm1, %v35_v8  ;;  %64 = vperm.xlu1 %1285, %v42_v10   ;;  %v46_v17 = vld [vmem:[%s1726_s2 + $0x38] sm:$0xff]  ;;  %vm1045_vm15 = vcmask 257024  }
   0xa   :  { %vm269_vm2 = vcmp.ge.s32.totalorder %v1461_v19, 16  ;;  %vm270_vm3 = vcmp.lt.s32.totalorder %v1461_v19, 32  ;;  %vm224_vm5 = vcmp.lt.s32.totalorder %v1461_v19, 16 }
   0xb   :  { %vm1465_vm4 = vmand %vm269_vm2, %vm270_vm3 }
   0xc   :  { %1156 = vmatmul.mubr.msk.f32.gmra.mrb[4].mxu0 %vm87_vm1, %v36_v11  ;;  %69 = vperm.xlu0 %1284, %v43_v13   ;;  %v338_v13 = vld [vmem:[%s1730_s6] sm:$0xff] }
   0xd   :  { %1158 = vmatprep.mubr.msk.f32.mxu0 %vm87_vm1, %v37_v12  ;;  %74 = vperm.xlu1 %1285, %v44_v14   ;;  %v339_v14 = vld [vmem:[%s1730_s6 + $0x8] sm:$0xff] }
  0x10   :  { %1159 = vmatmul.mubr.msk.f32.gmra.mrb[6].mxu0 %vm87_vm1, %v38_v15  ;;  %79 = vperm.xlu0 %1284, %v45_v16   ;;  %v1555_v15 = vpack.c.bf16 %v339_v14, %v338_v13 }
  0x11   :  { %84 = vperm.xlu1 %1285, %v46_v17   ;;  %v340_v17 = vld [vmem:[%s1730_s6 + $0x10] sm:$0xff] }
  0x12   :  { %1247 = vmatprep.subr.bf16.mxu1 %v1555_v15 }
  0x13   :  { %1249 = vmatpush3.bf16.msra.mxu1 %v1555_v15 }
  0x83   :  { %v50_v20 = vpop.permute.xlu0 %49 }
  0x84   :  { %v60_v26 = vpop.permute.xlu1 %59 }
  0x87   :  { %v55_v21 = vpop.permute.xlu0 %54 }
  0x88   :  { %v65_v36 = vpop.permute.xlu1 %64 }
  0x8b   :  { %v70_v41 = vpop.permute.xlu0 %69 }
  0x8c   :  { %v75_v53 = vpop.permute.xlu1 %74 }
  0x8f   :  { %v80_v55 = vpop.permute.xlu0 %79 }
  0x90   :  { %v85_v2 = vpop.permute.xlu1 %84 }
  0xd7   :  { %v1151_v22 = vpop.f32.mrb[0].mxu0 }
  0xd8   :  { %v1470_v24 = vadd.f32 %v1151_v22, %v55_v21  ;;  %v182_v25 = vpop.f32.mrb[1].mxu0  ;;  %v1573_v22 = vld [vmem:[%s1731_s7] sm:$0x3] }
  0xd9   :  { %v1472_v27 = vadd.f32 %v182_v25, %v50_v20  ;;  %v341_v20 = vld [vmem:[%s1730_s6 + $0x18] sm:$0xff]  ;;  %1181 = vmatprep.subr.msk.mxu0 %vm497_vm7, %v1573_v22 }
  0xda   :  { %v275_v28 = vsel %vm1465_vm4, %v1470_v24, -inf  ;;  %v229_v29 = vsel %vm224_vm5, %v1470_v24, -inf  ;;  %v1566_v21 = vpack.c.bf16 %v341_v20, %v340_v17  ;;  %1182 = vmatpush3.msk.msra.mxu0 %vm497_vm7, %v1573_v22 }
  0xdb   :  { %v1154_v30 = vpop.f32.mrb[2].mxu0  ;;  %v285_v31 = vsel %vm236_vm6, %v275_v28, -inf  ;;  %v240_v32 = vsel %vm236_vm6, %v229_v29, -inf  ;;  %v228_v34 = vsel %vm224_vm5, %v1472_v27, -inf  ;;  %v274_v45 = vsel %vm1465_vm4, %v1472_v27, -inf }
  0xdc   :  { %286 = vmax.xlane.f32.xlu0 %v285_v31  ;;  %241 = vmax.xlane.f32.xlu1 %v240_v32  ;;  %v192_v33 = vpop.f32.mrb[3].mxu0  ;;  %v237_v38 = vsel %vm236_vm6, %v228_v34, -inf  ;;  %v1494_v42 = vadd.f32 %v1154_v30, %v65_v36  ;;  %v282_v49 = vsel %vm236_vm6, %v274_v45, -inf }
  0xdd   :  { %v1485_v35 = vadd.f32 %v192_v33, %v60_v26  ;;  %1251 = vmatprep.subr.bf16.mxu1 %v1566_v21 }
  0xde   :  { %v231_v51 = vsel %vm224_vm5, %v1494_v42, -inf  ;;  %v277_v58 = vsel %vm1465_vm4, %v1494_v42, -inf  ;;  %1253 = vmatpush3.bf16.msra.mxu1 %v1566_v21 }
  0xdf   :  { %v1157_v37 = vpop.f32.mrb[4].mxu0  ;;  %v230_v39 = vsel %vm224_vm5, %v1485_v35, -inf  ;;  %v276_v40 = vsel %vm1465_vm4, %v1485_v35, -inf  ;;  %v246_v54 = vsel %vm236_vm6, %v231_v51, -inf  ;;  %v291_v61 = vsel %vm236_vm6, %v277_v58, -inf }
  0xe0   :  { %v202_v43 = vpop.f32.mrb[5].mxu0  ;;  %238 = vmax.xlane.f32.xlu0 %v237_v38  ;;  %v243_v44 = vsel %vm236_vm6, %v230_v39, -inf  ;;  %v288_v47 = vsel %vm236_vm6, %v276_v40, -inf  ;;  %v1511_v56 = vadd.f32 %v1157_v37, %v75_v53 }
  0xe1   :  { %v1500_v46 = vadd.f32 %v202_v43, %v70_v41  ;;  %244 = vmax.xlane.f32.xlu1 %v243_v44 }
  0xe2   :  { %v233_v63 = vsel %vm224_vm5, %v1511_v56, -inf  ;;  %v279_v6 = vsel %vm1465_vm4, %v1511_v56, -inf }
  0xe3   :  { %v1160_v48 = vpop.f32.mrb[6].mxu0  ;;  %v232_v52 = vsel %vm224_vm5, %v1500_v46, -inf  ;;  %v278_v60 = vsel %vm1465_vm4, %v1500_v46, -inf  ;;  %v252_v3 = vsel %vm236_vm6, %v233_v63, -inf  ;;  %v297_v8 = vsel %vm236_vm6, %v279_v6, -inf }
  0xe4   :  { %v212_v50 = vpop.f32.mrb[7].mxu0  ;;  %283 = vmax.xlane.f32.xlu0 %v282_v49  ;;  %v249_v57 = vsel %vm236_vm6, %v232_v52, -inf  ;;  %v294_v62 = vsel %vm236_vm6, %v278_v60, -inf  ;;  %v1531_v4 = vadd.f32 %v1160_v48, %v85_v2 }
  0xe5   :  { %289 = vmax.xlane.f32.xlu1 %v288_v47  ;;  %v1517_v59 = vadd.f32 %v212_v50, %v80_v55 }
  0xe6   :  { %v235_v10 = vsel %vm224_vm5, %v1531_v4, -inf  ;;  %v281_v12 = vsel %vm1465_vm4, %v1531_v4, -inf }
  0xe7   :  { %v234_v1 = vsel %vm224_vm5, %v1517_v59, -inf  ;;  %v280_v7 = vsel %vm1465_vm4, %v1517_v59, -inf  ;;  %v258_v11 = vsel %vm236_vm6, %v235_v10, -inf  ;;  %v303_v16 = vsel %vm236_vm6, %v281_v12, -inf }
  0xe8   :  { %247 = vmax.xlane.f32.xlu0 %v246_v54  ;;  %v255_v5 = vsel %vm236_vm6, %v234_v1, -inf  ;;  %v300_v9 = vsel %vm236_vm6, %v280_v7, -inf }
  0xe9   :  { %250 = vmax.xlane.f32.xlu1 %v249_v57 }
  0xec   :  { %292 = vmax.xlane.f32.xlu0 %v291_v61 }
  0xed   :  { %295 = vmax.xlane.f32.xlu1 %v294_v62 }
  0xf0   :  { %253 = vmax.xlane.f32.xlu0 %v252_v3 }
  0xf1   :  { %256 = vmax.xlane.f32.xlu1 %v255_v5 }
  0xf4   :  { %298 = vmax.xlane.f32.xlu0 %v297_v8 }
  0xf5   :  { %301 = vmax.xlane.f32.xlu1 %v300_v9 }
  0xf8   :  { %259 = vmax.xlane.f32.xlu0 %v258_v11 }
  0xfc   :  { %304 = vmax.xlane.f32.xlu0 %v303_v16 }
 0x169   :  { %v287_v25 = vpop.xlane.xlu0 %286  ;;  %v242_v26 = vpop.xlane.xlu1 %241 }
 0x16a   :  { %v262_v28 = vsel %vm224_vm5, %v242_v26, 0.0 }
 0x16b   :  { %v307_v29 = vsel %vm1465_vm4, %v287_v25, %v262_v28 }
 0x16c   :  { %v315_v31 = vsub.f32 %v1470_v24, %v307_v29 }
 0x16d   :  { %v239_v30 = vpop.xlane.xlu0 %238 }
 0x16e   :  { %v245_v32 = vpop.xlane.xlu1 %244  ;;  %v261_v34 = vsel %vm224_vm5, %v239_v30, 0.0  ;;  %v324_v37 = vmul.f32 1.442695, %v315_v31  ;;  %v1347_v31 = vmov 0.0|0.0  }
 0x16f   :  { %v263_v33 = vsel %vm224_vm5, %v245_v32, 0.0  ;;  %1254 = vmatprep.subr.bf16.mxu1 %v1347_v31  ;;  %v1349_v32 = vmov 0.0  }
 0x170   :  { %1286 = vpow2.f32 %v324_v37  ;;  %1225 = vmatprep.subr.mxu0 %v1349_v32 }
 0x171   :  { %v284_v36 = vpop.xlane.xlu0 %283 }
 0x172   :  { %v306_v38 = vsel %vm1465_vm4, %v284_v36, %v261_v34  ;;  %v290_v39 = vpop.xlane.xlu1 %289 }
 0x173   :  { %v314_v40 = vsub.f32 %v1472_v27, %v306_v38  ;;  %v308_v41 = vsel %vm1465_vm4, %v290_v39, %v263_v33 }
 0x174   :  { %v316_v24 = vsub.f32 %v1485_v35, %v308_v41 }
 0x175   :  { %v322_v43 = vmul.f32 1.442695, %v314_v40  ;;  %v248_v44 = vpop.xlane.xlu0 %247 }
 0x176   :  { %v326_v45 = vmul.f32 1.442695, %v316_v24  ;;  %v251_v47 = vpop.xlane.xlu1 %250  ;;  %v264_v48 = vsel %vm224_vm5, %v248_v44, 0.0 }
 0x177   :  { %1288 = vpow2.f32 %v322_v43  ;;  %v265_v50 = vsel %vm224_vm5, %v251_v47, 0.0 }
 0x178   :  { %1290 = vpow2.f32 %v326_v45 }
 0x179   :  { %v293_v49 = vpop.xlane.xlu0 %292 }
 0x17a   :  { %v309_v27 = vsel %vm1465_vm4, %v293_v49, %v264_v48  ;;  %v296_v51 = vpop.xlane.xlu1 %295  ;;  %v1604_v60 = vpop.eup %1286 }
 0x17b   :  { %v317_v35 = vsub.f32 %v1494_v42, %v309_v27  ;;  %v310_v52 = vsel %vm1465_vm4, %v296_v51, %v265_v50 }
 0x17c   :  { %v318_v53 = vsub.f32 %v1500_v46, %v310_v52 }
 0x17d   :  { %v328_v54 = vmul.f32 1.442695, %v317_v35  ;;  %v254_v55 = vpop.xlane.xlu0 %253 }
 0x17e   :  { %v330_v57 = vmul.f32 1.442695, %v318_v53  ;;  %v257_v58 = vpop.xlane.xlu1 %256  ;;  %v266_v62 = vsel %vm224_vm5, %v254_v55, 0.0 }
 0x17f   :  { %1292 = vpow2.f32 %v328_v54  ;;  %v267_v1 = vsel %vm224_vm5, %v257_v58, 0.0 }
 0x180   :  { %1294 = vpow2.f32 %v330_v57 }
 0x181   :  { %v1606_v61 = vpop.eup %1288  ;;  %v299_v63 = vpop.xlane.xlu0 %298 }
 0x182   :  { %v1610_v42 = vpop.eup %1290  ;;  %v311_v46 = vsel %vm1465_vm4, %v299_v63, %v266_v62  ;;  %v302_v2 = vpop.xlane.xlu1 %301  ;;  %1169 = vmatprep.mubr.msk.f32.mxu1 %vm236_vm6, %v1606_v61  ;;  %v622_v63 = vld [vmem:[%s1727_s3] sm:$0xf] }
 0x183   :  { %v319_v3 = vsub.f32 %v1511_v56, %v311_v46  ;;  %v312_v5 = vsel %vm1465_vm4, %v302_v2, %v267_v1  ;;  %1170 = vmatmul.mubr.msk.f32.vlgmr.msra.gmra.mrb[0].mxu1 %vm236_vm6, %v1604_v60 }
 0x184   :  { %v320_v6 = vsub.f32 %v1517_v59, %v312_v5  ;;  %1172 = vmatprep.mubr.msk.f32.mxu1 %vm236_vm6, %v1610_v42 }
 0x185   :  { %v332_v7 = vmul.f32 1.442695, %v319_v3  ;;  %v260_v8 = vpop.xlane.xlu0 %259 }
 0x186   :  { %v334_v9 = vmul.f32 1.442695, %v320_v6  ;;  %v268_v56 = vsel %vm224_vm5, %v260_v8, 0.0 }
 0x187   :  { %1296 = vpow2.f32 %v332_v7 }
 0x188   :  { %1298 = vpow2.f32 %v334_v9 }
 0x189   :  { %v1626_v10 = vpop.eup %1292  ;;  %v305_v11 = vpop.xlane.xlu0 %304 }
 0x18a   :  { %v1630_v12 = vpop.eup %1294  ;;  %v313_v13 = vsel %vm1465_vm4, %v305_v11, %v268_v56  ;;  %1173 = vmatmul.mubr.msk.f32.gmra.mrb[2].mxu1 %vm236_vm6, %v1626_v10 }
 0x18b   :  { %v321_v59 = vsub.f32 %v1531_v4, %v313_v13  ;;  %1175 = vmatprep.mubr.msk.f32.mxu1 %vm236_vm6, %v1630_v12 }
 0x18d   :  { %v336_v14 = vmul.f32 1.442695, %v321_v59 }
 0x18f   :  { %1300 = vpow2.f32 %v336_v14 }
 0x191   :  { %v1639_v16 = vpop.eup %1296 }
 0x192   :  { %v1641_v19 = vpop.eup %1298  ;;  %1176 = vmatmul.mubr.msk.f32.gmra.mrb[4].mxu1 %vm236_vm6, %v1639_v16 }
 0x193   :  { %1178 = vmatprep.mubr.msk.f32.mxu1 %vm236_vm6, %v1641_v19 }
 0x199   :  { %v1647_v23 = vpop.eup %1300 }
 0x19a   :  { %1179 = vmatmul.mubr.msk.f32.gmra.mrb[6].mxu1 %vm236_vm6, %v1647_v23 }
 0x19b   :  { %1211 = vmatprep.mubr.msk.f32.mxu1 %vm1348_vm9, %v1349_v32 }
 0x256   :  { %v1171_v4 = vpop.f32.mrb[0].mxu1 }
 0x257   :  { %v433_v17 = vpop.f32.mrb[1].mxu1 }
 0x258   :  { %1183 = vmatprep.mubr.msk.f32.mxu0 %vm472_vm8, %v433_v17 }
 0x259   :  { %1184 = vmatmul.mubr.msk.f32.vlgmr.msra.gmra.mrb[8].mxu0 %vm472_vm8, %v1171_v4 }
 0x25a   :  { %1226 = vmatpush3.msk.msra.mxu0 %vm497_vm7, %v1573_v22 }
 0x25b   :  { %1241 = vmatprep.subr.mxu0 %v1349_v32 }
 0x25d   :  { %v1174_v20 = vpop.f32.mrb[2].mxu1 }
 0x25e   :  { %v443_v25 = vpop.f32.mrb[3].mxu1 }
 0x25f   :  { %1186 = vmatprep.mubr.msk.f32.mxu0 %vm472_vm8, %v443_v25 }
 0x260   :  { %1187 = vmatmul.mubr.msk.f32.gmra.mrb[10].mxu0 %vm472_vm8, %v1174_v20 }
 0x265   :  { %v1177_v26 = vpop.f32.mrb[4].mxu1 }
 0x266   :  { %v453_v28 = vpop.f32.mrb[5].mxu1 }
 0x267   :  { %1189 = vmatprep.mubr.msk.f32.mxu0 %vm472_vm8, %v453_v28 }
 0x268   :  { %1190 = vmatmul.mubr.msk.f32.gmra.mrb[12].mxu0 %vm472_vm8, %v1177_v26 }
 0x26d   :  { %v1180_v29 = vpop.f32.mrb[6].mxu1 }
 0x26e   :  { %v463_v30 = vpop.f32.mrb[7].mxu1 }
 0x26f   :  { %1192 = vmatprep.mubr.msk.f32.mxu0 %vm472_vm8, %v463_v30 }
 0x270   :  { %1193 = vmatmul.mubr.msk.f32.gmra.mrb[14].mxu0 %vm472_vm8, %v1180_v29 }
 0x271   :  { %1227 = vmatprep.mubr.msk.f32.mxu0 %vm1348_vm9, %v1349_v32 }
 0x32c   :  { %v1185_v33 = vpop.f32.mrb[8].mxu0 }
 0x32d   :  { %1302 = vrcp.f32 %v1185_v33  ;;  %v567_v34 = vpop.f32.mrb[9].mxu0 }
 0x32e   :  { %1304 = vrcp.f32 %v567_v34 }
 0x333   :  { %v1188_v36 = vpop.f32.mrb[10].mxu0 }
 0x334   :  { %1306 = vrcp.f32 %v1188_v36  ;;  %v577_v37 = vpop.f32.mrb[11].mxu0 }
 0x335   :  { %1308 = vrcp.f32 %v577_v37 }
 0x337   :  { %v1303_v38 = vpop.eup %1302 }
 0x338   :  { %v1305_v39 = vpop.eup %1304  ;;  %v609_v40 = vmul.f32 %v1303_v38, %v1604_v60 }
 0x339   :  { %v607_v41 = vmul.f32 %v1305_v39, %v1606_v61 }
 0x33b   :  { %v1191_v24 = vpop.f32.mrb[12].mxu0  ;;  %v1255_v43 = vpack.c.bf16 %v609_v40, %v607_v41 }
 0x33c   :  { %1310 = vrcp.f32 %v1191_v24  ;;  %v587_v44 = vpop.f32.mrb[13].mxu0 }
 0x33d   :  { %1312 = vrcp.f32 %v587_v44  ;;  %1256 = vmatpush3.bf16.msra.mxu1 %v1255_v43 }
 0x33e   :  { %v1307_v45 = vpop.eup %1306  ;;  %1257 = vmatprep.subr.bf16.mxu1 %v1347_v31 }
 0x33f   :  { %v1309_v47 = vpop.eup %1308  ;;  %v613_v48 = vmul.f32 %v1307_v45, %v1626_v10 }
 0x340   :  { %v611_v49 = vmul.f32 %v1309_v47, %v1610_v42 }
 0x342   :  { %v1258_v50 = vpack.c.bf16 %v613_v48, %v611_v49 }
 0x343   :  { %v1194_v27 = vpop.f32.mrb[14].mxu0 }
 0x344   :  { %1314 = vrcp.f32 %v1194_v27  ;;  %v597_v51 = vpop.f32.mrb[15].mxu0  ;;  %1259 = vmatpush3.bf16.msra.mxu1 %v1258_v50 }
 0x345   :  { %1316 = vrcp.f32 %v597_v51  ;;  %1260 = vmatprep.subr.bf16.mxu1 %v1347_v31 }
 0x346   :  { %v1311_v35 = vpop.eup %1310 }
 0x347   :  { %v1313_v52 = vpop.eup %1312  ;;  %v617_v53 = vmul.f32 %v1311_v35, %v1639_v16  ;;  %v1023_v16 = vld [vmem:[%s1728_s4] sm:$0xf]  ;;  %s1351_s4 = smov [#allocation2]  }
 0x348   :  { %v615_v54 = vmul.f32 %v1313_v52, %v1630_v12  ;;  %1026 = vrot.lane.b32.xlu1 %v1023_v16, %s1350_s26 }
 0x34a   :  { %v1261_v55 = vpack.c.bf16 %v617_v53, %v615_v54 }
 0x34c   :  { %1262 = vmatpush3.bf16.msra.mxu1 %v1261_v55 }
 0x34d   :  { %1263 = vmatprep.subr.bf16.mxu1 %v1347_v31 }
 0x34e   :  { %v1315_v57 = vpop.eup %1314 }
 0x34f   :  { %v1317_v58 = vpop.eup %1316  ;;  %v621_v60 = vmul.f32 %v1315_v57, %v1647_v23 }
 0x350   :  { %v619_v61 = vmul.f32 %v1317_v58, %v1641_v19 }
 0x352   :  { %v1264_v62 = vpack.c.bf16 %v621_v60, %v619_v61 }
 0x354   :  { %1265 = vmatpush3.bf16.msra.mxu1 %v1264_v62 }
 0x355   :  { %1266 = vmatprep.subr.bf16.mxu1 %v1347_v31 }
 0x357   :  { %1212 = vmatmul.mubr.msk.f32.vlgmr.msra.gmra.mrb[8].mxu1 %vm623_vm10, %v622_v63 }
 0x358   :  { %1268 = vmatpush3.bf16.msra.mxu1 %v1555_v15  ;;  %1222 = vmatprep.mubr.msk.f32.mxu1 %vm1348_vm9, %v1349_v32 }
 0x359   :  { %1269 = vmatprep.subr.bf16.mxu1 %v1347_v31 }
 0x35c   :  { %1271 = vmatpush3.bf16.msra.mxu1 %v1566_v21 }
 0x35d   :  { %1272 = vmatprep.subr.bf16.mxu1 %v1347_v31 }
 0x3ba   :  { %v1027_v38 = vpop.permute.xlu1 %1026 }
 0x3bb   :  { %v1030_v43 = vsel %vm1029_vm14, %v1023_v16, %v1027_v38 }
 0x42a   :  { %v693_v42 = vpop.f32.mrb[8].mxu1 }
 0x42b   :  { %v1213_v1 = vpop.f32.mrb[9].mxu1  ;;  %1223 = vmatmul.mubr.msk.f32.vlgmr.msra.gmra.mrb[10].mxu1 %vm236_vm6, %v693_v42 }
 0x42c   :  { %1274 = vmatpush3.bf16.msra.mxu1 %v1555_v15  ;;  %1238 = vmatprep.mubr.msk.f32.mxu1 %vm1348_vm9, %v1349_v32  ;;  %v854_v15 = vshrl.u32 %v221_v18, 7 }
 0x42d   :  { %1275 = vmatprep.subr.bf16.mxu1 %v1347_v31 }
 0x430   :  { %1277 = vmatpush3.bf16.msra.mxu1 %v1566_v21  ;;  %v855_v21 = vsub.s32 0, %v854_v15 }
 0x4fe   :  { %v766_v46 = vpop.f32.mrb[10].mxu1 }
 0x4ff   :  { %v771_v2 = vsel %vm770_vm11, %v766_v46, 0.0  ;;  %v1224_v3 = vpop.f32.mrb[11].mxu1 }
 0x500   :  { %v772_v5 = vrot.slane %v771_v2, 4 }
 0x502   :  { %v773_v6 = vadd.f32 %v772_v5, %v771_v2 }
 0x504   :  { %v774_v7 = vrot.slane %v773_v6, 2 }
 0x506   :  { %v775_v8 = vadd.f32 %v774_v7, %v773_v6 }
 0x508   :  { %v776_v9 = vrot.slane %v775_v8, 1 }
 0x50a   :  { %v777_v10 = vadd.f32 %v776_v9, %v775_v8 }
 0x50c   :  { %v779_v56 = vmul.f32 0.015625, %v777_v10 }
 0x50e   :  { %1228 = vmatmul.mubr.msk.f32.vlgmr.msra.gmra.mrb[16].mxu0 %vm472_vm8, %v779_v56 }
 0x50f   :  { %1242 = vmatpush3.msk.msra.mxu0 %vm497_vm7, %v1573_v22  ;;  %1243 = vmatprep.mubr.msk.f32.mxu0 %vm1348_vm9, %v1349_v32  ;;  %v1024_v22 = vld [vmem:[%s1729_s5] sm:$0xf]  ;;  %s1053_s5 = sshll.u32 %s1351_s4, 4  ;;  %s1054_s5 = int_to_ptr.vmem [resolvable:$true] %s1053_s5 }
 0x510   :  { %1032 = vrot.lane.b32.xlu0 %v1024_v22, %s1350_s26  ;;  %s1322_s27 = scalar_lea.vmem %s1054_s5, 64  ;;  %p1327_p1 = scmp.lt.s32.totalorder %s1054_s5, %s1054_s5 }
 0x511   :  { %p1323_p0 = scmp.ne.s32.totalorder %s1054_s5, %s1322_s27  ;;  %p1328_p2 = scmp.lt.s32.totalorder %s1322_s27, %s1322_s27 }
 0x513   :  { %p1329_p3 = por %p1328_p2, %p1327_p1 }
 0x515   :  { %p1330_p4 = pnand %p1329_p3, %p1323_p0 }
 0x582   :  { %v1033_v24 = vpop.permute.xlu0 %1032 }
 0x583   :  { %v1035_v45 = vsel %vm1029_vm14, %v1024_v22, %v1033_v24 }
 0x5e1   :  { %v849_v11 = vpop.f32.mrb[16].mxu0 }
 0x5e2   :  { %v856_v12 = vrot.slane %v849_v11, %v855_v21  ;;  %v1229_v13 = vpop.f32.mrb[17].mxu0 }
 0x5e4   :  { %v857_v59 = vsub.f32 %v693_v42, %v856_v12 }
 0x5e6   :  { %v858_v14 = vmul.f32 %v857_v59, %v857_v59 }
 0x5e8   :  { %1239 = vmatmul.mubr.msk.f32.vlgmr.msra.gmra.mrb[12].mxu1 %vm236_vm6, %v858_v14 }
 0x6bb   :  { %v928_v18 = vpop.f32.mrb[12].mxu1 }
 0x6bc   :  { %v932_v19 = vsel %vm770_vm11, %v928_v18, 0.0  ;;  %v1240_v23 = vpop.f32.mrb[13].mxu1 }
 0x6bd   :  { %v933_v4 = vrot.slane %v932_v19, 4 }
 0x6bf   :  { %v934_v17 = vadd.f32 %v933_v4, %v932_v19 }
 0x6c1   :  { %v935_v20 = vrot.slane %v934_v17, 2 }
 0x6c3   :  { %v936_v25 = vadd.f32 %v935_v20, %v934_v17 }
 0x6c5   :  { %v937_v26 = vrot.slane %v936_v25, 1 }
 0x6c7   :  { %v938_v28 = vadd.f32 %v937_v26, %v936_v25 }
 0x6c9   :  { %v939_v29 = vmul.f32 0.015625, %v938_v28 }
 0x6cb   :  { %v940_v30 = vadd.f32 1e-05, %v939_v29 }
 0x6cd   :  { %1318 = vrsqrt.f32 %v940_v30  ;;  %vm943_vm12 = vcmp.eq.f32.partialorder %v940_v30, inf  ;;  %v946_v33 = vand.u32 2147483648, %v940_v30  ;;  %vm945_vm13 = vcmp.eq.f32.partialorder %v940_v30, 0.0 }
 0x6d7   :  { %v1319_v31 = vpop.eup %1318 }
 0x6d8   :  { %v942_v32 = vmul.f32 %v1319_v31, %v940_v30 }
 0x6da   :  { %v944_v34 = vsel %vm943_vm12, %v940_v30, %v942_v32 }
 0x6db   :  { %v947_v36 = vsel %vm945_vm13, %v946_v33, %v944_v34 }
 0x6dc   :  { %1320 = vrcp.f32 %v947_v36 }
 0x6e6   :  { %v1321_v37 = vpop.eup %1320 }
 0x6e7   :  { %1244 = vmatmul.mubr.msk.f32.vlgmr.msra.gmra.mrb[18].mxu0 %vm472_vm8, %v1321_v37 }
 0x7ba   :  { %v1019_v39 = vpop.f32.mrb[18].mxu0 }
 0x7bb   :  { %v1039_v40 = vrot.slane %v1019_v39, %v855_v21  ;;  %v1245_v41 = vpop.f32.mrb[19].mxu0 }
 0x7bd   :  { %v1040_v44 = vmul.f32 %v1039_v40, %v857_v59 }
 0x7bf   :  { %v1041_v47 = vmul.f32 %v1040_v44, %v1030_v43 }
 0x7c1   :  { %v1042_v48 = vadd.f32 %v1041_v47, %v1035_v45 }
 0x7c3   :  { %v1043_v49 = vadd.f32 %v1042_v48, %v1400_v0 }
 0x7c5   :  { %v1044_v50 = vmax.f32 %v1043_v49, 0.0 }
 0x7c7   :  { %1046 = vst.msk [vmem:[#allocation2] sm:$0xf] %vm1045_vm15, %v1044_v50 }
 0x7c8   :  { %1333 = shalt.err (!%p1330_p4)
}
 0x7c9   :  { %s1334_s30 = scalar_lea.hbm %s1732_s8, 64 }
 0x7ca   :  { %p1335_p5 = scmp.ne.s32.totalorder %s1732_s8, %s1334_s30  ;;  %p1338_p6 = scmp.lt.u32.totalorder %s1334_s30, %s1732_s8 }
 0x7cc   :  { %p1340_p7 = pnand %p1338_p6, %p1335_p5 }
 0x7ce   :  { %1343 = shalt.err (!%p1340_p7)
}
 0x7cf   :  { %1056 = dma.vmem_to_hbm [thread:$0]  %s1054_s5, 64, %s1732_s8, [#allocation3]  }
 0x7d0   :  { %1344 = dma.done.wait [#allocation3], 64  }
 0x7d1   :  { %1345 = vsyncadd [#allocation3], 4294967232 }
 0x7d2   :  { %1060 = vsyncpa [#allocation3], 1 }

</bundles_post_ra>
